<compile_context>
chip_gen: v7x
topology: tpu7x:2x2x1
jax: 0.10.0
libtpu: 0.0.40
codegen_flags: <defaults>
</compile_context>

<pallas_src>
import functools
import math

import numpy as np

import jax
import jax.numpy as jnp
from jax import lax
from jax.experimental import pallas as pl
from jax.experimental.pallas import tpu as pltpu


_LANES = 128
_ACC_ROWS = 64          # accumulator height: 8 f32 vregs -> 8 independent add chains


def _cdiv(a: int, b: int) -> int:
    return -(-a // b)


def _round_up(a: int, m: int) -> int:
    return _cdiv(a, m) * m


def _chip_config():
    """(tensorcores_per_device, max_tile_rows) with safe fallbacks."""
    kind = ""
    try:
        kind = (jax.devices()[0].device_kind or "").lower()
    except Exception:
        pass
    # Chips that expose a single TensorCore per JAX device.
    single_tc = any(t in kind for t in
                    ("v2", "v3", "v5e", "v5 lite", "v5lite", "v6e", "v6 lite", "v6lite"))
    n_cores = 1 if single_tc else 2          # unknown/v4/v5p/v7x -> 2 (harmless if wrong)
    # ~2 MiB input blocks on <=v6e, ~4 MiB on v7x-class HBM (3.2 TB/s per TC),
    # keeping the fixed per-grid-step overhead well under 10% of the DMA time.
    max_tile_rows = 8192 if "v7" in kind else 4096
    return n_cores, max_tile_rows


def _zero_log_pad_value(eps: float) -> float:
    """A float32 v such that fl(v + eps) == 1.0, i.e. log(v + eps) == 0 exactly."""
    e = np.float32(eps)
    v = np.float32(1.0) - e
    for _ in range(8):
        s = np.float32(v) + e
        if s == np.float32(1.0):
            return float(v)
        v = np.nextafter(v, np.float32(2.0) if s < np.float32(1.0) else np.float32(0.0))
    # Fallback: |log(v+eps)| <= ~1.2e-7 per pad element -> negligible in the mean.
    return float(np.float32(1.0) - e)


def _adv_loss_kernel(x_ref, o_ref, acc_ref, *, eps, acc_rows, n_chunks, unroll, inv_n):
    j = pl.program_id(1)                      # reduction ("arbitrary") axis

    @pl.when(j == 0)
    def _init():
        acc_ref[...] = jnp.zeros_like(acc_ref)

    # Chunked streaming accumulation: EUP log + VPU adds into a register-carried
    # (acc_rows, 128) accumulator; no whole-tile temporary is materialized.
    def body(c, acc):
        r0 = pl.multiple_of(c * acc_rows, acc_rows)
        return acc + jnp.log(x_ref[pl.ds(r0, acc_rows), :] + eps)

    acc_ref[...] = lax.fori_loop(0, n_chunks, body, acc_ref[...], unroll=unroll)

    @pl.when(j == pl.num_programs(1) - 1)
    def _finalize():
        # One-shot XLU reduce + scale (XLU/scalar slots are idle on the hot path).
        col = jnp.sum(acc_ref[...], axis=0, keepdims=True)   # (1, 128) sublane reduce
        tot = jnp.sum(col, axis=1, keepdims=True)            # (1, 1)   lane reduce
        o_ref[0] = tot * (-inv_n)                            # negate + mean here


def adv_loss(inputs: jax.Array, eps: float = 1e-5) -> jax.Array:
    """Pallas implementation of AdvLoss.forward. Returns a scalar float32."""
    x = inputs.astype(jnp.float32)
    n_elems = int(x.size)
    n_cores, max_tile_rows = _chip_config()

    # ---- tiling: lane-dense (rows, 128) slab, tiles sized for the HBM roofline.
    rows_data = _cdiv(n_elems, _LANES)
    rows_min = _round_up(rows_data, 8)
    if rows_min <= max_tile_rows:
        n_par, tiles_per_par, tile_rows = 1, 1, rows_min
    else:
        n_par = n_cores
        n_tiles = _round_up(_cdiv(rows_data, max_tile_rows), n_par)   # balanced split
        tile_rows = _round_up(_cdiv(rows_data, n_tiles), _ACC_ROWS)   # mult. of 64, <= max
        tiles_per_par = n_tiles // n_par
    n_tiles = n_par * tiles_per_par
    total_rows = tile_rows * n_tiles
    total_elems = total_rows * _LANES

    acc_rows = math.gcd(tile_rows, _ACC_ROWS)     # 64 for big tiles, >=8 for tiny ones
    n_chunks = tile_rows // acc_rows

    # ---- pad so every block is full; pad value contributes exactly 0 to the sum,
    # so no in-kernel masking is needed anywhere on the stream.
    flat = x.reshape(-1)
    if total_elems != n_elems:
        flat = jnp.pad(flat, (0, total_elems - n_elems),
                       constant_values=_zero_log_pad_value(eps))
    slab = flat.reshape(total_rows, _LANES)

    kernel = functools.partial(
        _adv_loss_kernel,
        eps=float(eps),
        acc_rows=acc_rows,
        n_chunks=n_chunks,
        unroll=min(8, n_chunks),
        inv_n=1.0 / n_elems,
    )

    partials = pl.pallas_call(
        kernel,
        out_shape=jax.ShapeDtypeStruct((n_par, 1, 1), jnp.float32),
        grid_spec=pltpu.PrefetchScalarGridSpec(
            num_scalar_prefetch=0,
            grid=(n_par, tiles_per_par),
            in_specs=[
                pl.BlockSpec((tile_rows, _LANES),
                             lambda p, j: (p * tiles_per_par + j, 0)),
            ],
            out_specs=pl.BlockSpec((1, 1, 1), lambda p, j: (p, 0, 0)),
            scratch_shapes=[pltpu.VMEM((acc_rows, _LANES), jnp.float32)],
        ),
        compiler_params=pltpu.CompilerParams(
            dimension_semantics=("parallel", "arbitrary"),
            vmem_limit_bytes=32 * 1024 * 1024,
        ),
        cost_estimate=pl.CostEstimate(
            flops=2 * total_elems,
            transcendentals=total_elems,
            bytes_accessed=4 * total_elems + 4 * n_par,
        ),
    )(slab)

    # Each shard already wrote -partial_sum / n_elems; just combine the n_par scalars.
    return partials.sum() if n_par > 1 else partials.reshape(())


def _adv_loss_ref(inputs: jax.Array, eps: float = 1e-5) -> jax.Array:
    # Pure-JAX reference matching the PyTorch module exactly.
    loss = -jnp.log(inputs.astype(jnp.float32) + eps).mean(axis=1)
    return loss.mean()


if __name__ == "__main__":
    key = jax.random.PRNGKey(0)
    shapes = [
        (2, 4, 16, 16),    # primary example (B, C, H, W): single lane-aligned tile
        (2, 3, 15, 17),    # ragged size: exercises the zero-contribution padding path
        (4, 64, 64, 65),   # multi-tile: exercises the grid split / megacore sharding
    ]
    for i, shp in enumerate(shapes):
        k = jax.random.fold_in(key, i)
        # AdvLoss expects probability-like positive inputs.
        x = jax.random.uniform(k, shp, jnp.float32, minval=0.05, maxval=1.0)
        out = jax.block_until_ready(adv_loss(x))
        ref = jax.block_until_ready(_adv_loss_ref(x))
        assert jnp.allclose(out, ref, rtol=1e-4, atol=1e-6), (shp, out, ref)
    print("KERNEL_OK")
</pallas_src>

<mosaic_0001>
module attributes {stable_mosaic.version = 11 : i64} {
  func.func @_adv_loss_kernel(%arg0: i32, %arg1: i32, %arg2: memref<16x128xf32, #tpu.memory_space<vmem>>, %arg3: memref<1x1x1xf32, #tpu.memory_space<vmem>>, %arg4: memref<16x128xf32, #tpu.memory_space<vmem>>) attributes {dimension_semantics = [#tpu.dimension_semantics<parallel>, #tpu.dimension_semantics<arbitrary>], iteration_bounds = array<i64: 1, 1>, scalar_prefetch = 0 : i64, scratch_operands = 1 : i64, tpu.core_type = #tpu.core_type<tc>, window_params = [{transform_indices = @transform_0, window_bounds = array<i64: 16, 128>}, {transform_indices = @transform_1, window_bounds = array<i64: 1, 1, 1>}]} {
    %c0_i32 = arith.constant 0 : i32
    %0 = arith.cmpi eq, %arg1, %c0_i32 : i32
    %1 = arith.extui %0 : i1 to i32
    %c0_i32_0 = arith.constant 0 : i32
    %2 = arith.cmpi ne, %1, %c0_i32_0 : i32
    scf.if %2 {
      %cst_8 = arith.constant 0.000000e+00 : f32
      %16 = vector.broadcast %cst_8 : f32 to vector<16x128xf32>
      %c0_9 = arith.constant 0 : index
      %c0_10 = arith.constant 0 : index
      %17 = vector.load %arg4[%c0_9, %c0_10] : memref<16x128xf32, #tpu.memory_space<vmem>>, vector<16x128xf32>
      tpu.vector_store %arg4[%c0_9, %c0_10], %16 {strides = array<i32>} : memref<16x128xf32, #tpu.memory_space<vmem>>, vector<16x128xf32>,
    } else {
    }
    %c0 = arith.constant 0 : index
    %c0_1 = arith.constant 0 : index
    %3 = vector.load %arg4[%c0, %c0_1] : memref<16x128xf32, #tpu.memory_space<vmem>>, vector<16x128xf32>
    %c0_i32_2 = arith.constant 0 : i32
    %c16_i32 = arith.constant 16 : i32
    %4 = arith.muli %c0_i32_2, %c16_i32 : i32
    %5 = tpu.assume_multiple %4, 16 : i32
    %6 = arith.index_cast %5 : i32 to index
    %c0_3 = arith.constant 0 : index
    %7 = vector.load %arg2[%6, %c0_3] : memref<16x128xf32, #tpu.memory_space<vmem>>, vector<16x128xf32>
    %cst = arith.constant 9.99999974E-6 : f32
    %8 = vector.broadcast %cst : f32 to vector<16x128xf32>
    %9 = arith.addf %7, %8 : vector<16x128xf32>
    %10 = math.log %9 : vector<16x128xf32>
    %11 = arith.addf %3, %10 : vector<16x128xf32>
    %c1_i32 = arith.constant 1 : i32
    %c0_4 = arith.constant 0 : index
    %c0_5 = arith.constant 0 : index
    %12 = vector.load %arg4[%c0_4, %c0_5] : memref<16x128xf32, #tpu.memory_space<vmem>>, vector<16x128xf32>
    tpu.vector_store %arg4[%c0_4, %c0_5], %11 {strides = array<i32>} : memref<16x128xf32, #tpu.memory_space<vmem>>, vector<16x128xf32>,
    %c0_i32_6 = arith.constant 0 : i32
    %13 = arith.cmpi eq, %arg1, %c0_i32_6 : i32
    %14 = arith.extui %13 : i1 to i32
    %c0_i32_7 = arith.constant 0 : i32
    %15 = arith.cmpi ne, %14, %c0_i32_7 : i32
    scf.if %15 {
      %c0_8 = arith.constant 0 : index
      %c0_9 = arith.constant 0 : index
      %16 = vector.load %arg4[%c0_8, %c0_9] : memref<16x128xf32, #tpu.memory_space<vmem>>, vector<16x128xf32>
      %cst_10 = arith.constant dense<0.000000e+00> : vector<128xf32>
      %17 = vector.multi_reduction <add>, %16, %cst_10 [0] : vector<16x128xf32> to vector<128xf32>
      %18 = vector.shape_cast %17 : vector<128xf32> to vector<1x128xf32>
      %cst_11 = arith.constant dense<0.000000e+00> : vector<1xf32>
      %19 = vector.multi_reduction <add>, %18, %cst_11 [1] : vector<1x128xf32> to vector<1xf32>
      %20 = vector.shape_cast %19 : vector<1xf32> to vector<1x1xf32>
      %cst_12 = arith.constant -4.8828125E-4 : f32
      %21 = vector.broadcast %cst_12 : f32 to vector<1x1xf32>
      %22 = arith.mulf %20, %21 : vector<1x1xf32>
      %c0_13 = arith.constant 0 : index
      %c0_14 = arith.constant 0 : index
      %c0_15 = arith.constant 0 : index
      %23 = vector.load %arg3[%c0_13, %c0_14, %c0_15] : memref<1x1x1xf32, #tpu.memory_space<vmem>>, vector<1x1x1xf32>
      %24 = vector.shape_cast %23 : vector<1x1x1xf32> to vector<1x1xf32>
      %25 = vector.shape_cast %22 : vector<1x1xf32> to vector<1x1x1xf32>
      tpu.vector_store %arg3[%c0_13, %c0_14, %c0_15], %25 {strides = array<i32>} : memref<1x1x1xf32, #tpu.memory_space<vmem>>, vector<1x1x1xf32>,
    } else {
    }
    return
  }
  func.func @transform_0(%arg0: i32, %arg1: i32) -> (i32, i32) {
    %c1_i32 = arith.constant 1 : i32
    %0 = arith.muli %arg0, %c1_i32 : i32
    %1 = arith.addi %0, %arg1 : i32
    %c0_i32 = arith.constant 0 : i32
    %c0_i32_0 = arith.constant 0 : i32
    return %1, %c0_i32 : i32, i32
  }
  func.func @transform_1(%arg0: i32, %arg1: i32) -> (i32, i32, i32) {
    %c0_i32 = arith.constant 0 : i32
    %c0_i32_0 = arith.constant 0 : i32
    %c0_i32_1 = arith.constant 0 : i32
    return %arg0, %c0_i32, %c0_i32_0 : i32, i32, i32
  }
}

</mosaic_0001>

<bundles_post_ra>
// kernel: tpu_custom_call.1
= control target key start
LH: loop header
LB: loop body
LE: loop exit
PB: predicated region body
PF: predicated region fallthrough
CT: control target
= control target key end

     0   :  { %6 = vsyncpa [#allocation4], 0  ;;  %s175_s0 = inlined_call_operand.hbm [shape: f32[16,128], index: 0, kind: input, shape index: {}]   ;;  %s176_s1 = inlined_call_operand.hbm [shape: f32[1,1,1], index: 1, kind: output, shape index: {}]  }
   0x1   :  { %7 = vsyncpa [#allocation5], 0  ;;  %s137_s6 = smov [#allocation3]   ;;  %s89_s10 = scalar_lea.hbm %s175_s0, 256 }
   0x2   :  { %s17_s7 = sshll.u32 %s137_s6, 4  ;;  %p90_p0 = scmp.ne.s32.totalorder %s175_s0, %s89_s10  ;;  %s18_s7 = int_to_ptr.vmem [resolvable:$true] %s17_s7 }
   0x3   :  { %p93_p1 = scmp.lt.u32.totalorder %s89_s10, %s175_s0 }
   0x5   :  { %p95_p2 = pnand %p93_p1, %p90_p0 }
   0x7   :  { %98 = shalt.err (!%p95_p2)
}
   0x8   :  { %s99_s15 = scalar_lea.vmem %s18_s7, 256  ;;  %p104_p4 = scmp.lt.s32.totalorder %s18_s7, %s18_s7 }
   0x9   :  { %p100_p3 = scmp.ne.s32.totalorder %s18_s7, %s99_s15  ;;  %p105_p5 = scmp.lt.s32.totalorder %s99_s15, %s99_s15 }
   0xb   :  { %p106_p6 = por %p105_p5, %p104_p4 }
   0xd   :  { %p107_p7 = pnand %p106_p6, %p100_p3 }
   0xf   :  { %110 = shalt.err (!%p107_p7)
}
  0x10   :  { %s138_s16 = smov 128   ;;  %s139_s17 = smov 8  }
  0x11   :  { %23 = dma.hbm_to_vmem [thread:$0]  %s175_s0, 256, %s18_s7, [#allocation4], %s138_s16, %s138_s16, %s139_s17  }
  0x12   :  { %133 = dma.done.wait [#allocation4], 256  }
  0x13   :  { %134 = vsyncadd [#allocation4], 4294967040  ;;  %v37_v0 = vld [vmem:[#allocation3] sm:$0xff]  ;;  %v38_v1 = vld [vmem:[#allocation3 + $0x8] sm:$0xff]  ;;  %s140_s0 = smov [#allocation6]   ;;  %vm64_vm0 = vcmask 0  }
  0x14   :  { %v39_v2 = vadd.f32 1e-05, %v37_v0  ;;  %v40_v3 = vadd.f32 1e-05, %v38_v1  ;;  %s72_s20 = sshll.u32 %s140_s0, 4  ;;  %s73_s20 = int_to_ptr.vmem [resolvable:$true] %s72_s20 }
  0x15   :  { %s111_s21 = scalar_lea.vmem %s73_s20, 16  ;;  %s115_s22 = scalar_lea.vmem %s73_s20, 32 }
  0x16   :  { %85 = vlog2.f32 %v39_v2  ;;  %p112_p8 = scmp.ne.s32.totalorder %s73_s20, %s111_s21  ;;  %p116_p9 = scmp.lt.s32.totalorder %s73_s20, %s73_s20 }
  0x17   :  { %87 = vlog2.f32 %v40_v3  ;;  %p117_p10 = scmp.lt.s32.totalorder %s115_s22, %s111_s21 }
  0x19   :  { %p118_p11 = por %p117_p10, %p116_p9 }
  0x1b   :  { %p119_p12 = pnand %p118_p11, %p112_p8 }
  0x20   :  { %v86_v4 = vpop.eup %85 }
  0x21   :  { %v88_v5 = vpop.eup %87  ;;  %v42_v6 = vmul.f32 0.6931472, %v86_v4 }
  0x22   :  { %v44_v7 = vmul.f32 0.6931472, %v88_v5 }
  0x24   :  { %v54_v8 = vadd.f32 %v44_v7, %v42_v6 }
  0x26   :  { %v55_v9 = vrot.slane %v54_v8, 4 }
  0x28   :  { %v56_v10 = vadd.f32 %v55_v9, %v54_v8 }
  0x2a   :  { %v57_v11 = vrot.slane %v56_v10, 2 }
  0x2c   :  { %v58_v12 = vadd.f32 %v57_v11, %v56_v10 }
  0x2e   :  { %v59_v13 = vrot.slane %v58_v12, 1 }
  0x30   :  { %v60_v14 = vadd.f32 %v59_v13, %v58_v12 }
  0x32   :  { %61 = vadd.xlane.f32.xlu0 %v60_v14 }
  0xbf   :  { %v62_v15 = vpop.xlane.xlu0 %61 }
  0xc0   :  { %v63_v16 = vmul.f32 -0.00048828125, %v62_v15 }
  0xc2   :  { %65 = vst.msk [vmem:[#allocation6] sm:$0x1] %vm64_vm0, %v63_v16 }
  0xc3   :  { %122 = shalt.err (!%p119_p12)
}
  0xc4   :  { %s123_s25 = scalar_lea.hbm %s176_s1, 16 }
  0xc5   :  { %p124_p13 = scmp.ne.s32.totalorder %s176_s1, %s123_s25  ;;  %p127_p0 = scmp.lt.u32.totalorder %s123_s25, %s176_s1 }
  0xc7   :  { %p129_p1 = pnand %p127_p0, %p124_p13 }
  0xc9   :  { %132 = shalt.err (!%p129_p1)
}
  0xca   :  { %75 = dma.vmem_to_hbm [thread:$0]  %s73_s20, 16, %s176_s1, [#allocation5]  }
  0xcb   :  { %135 = dma.done.wait [#allocation5], 16  }
  0xcc   :  { %136 = vsyncadd [#allocation5], 4294967280 }
  0xcd   :  { %79 = vsyncpa [#allocation4], 1 }
  0xce   :  { %80 = vsyncpa [#allocation5], 1 }

</bundles_post_ra>
